<compile_context>
chip_gen: v7x
topology: tpu7x:2x2x1
jax: 0.10.0
libtpu: 0.0.40
codegen_flags: <defaults>
</compile_context>

<pallas_src>
import functools

import numpy as np

import jax
import jax.numpy as jnp
from jax.experimental import pallas as pl
from jax.experimental.pallas import tpu as pltpu


_BIG_IDX = 2**30 - 1  # "no failure in this tile" sentinel (>> any row index)


def _round_up(x: int, m: int) -> int:
    return ((x + m - 1) // m) * m


def _make_kernel(output_type: str, conf: float, n_iter: int, tile_n: int,
                 use_boxes: bool):
    """Builds the Pallas kernel body for a fixed static config."""

    def body(post_ref, box_ref, out_ref, k_ref):
        t = pl.program_id(0)

        @pl.when(t == 0)
        def _():
            out_ref[...] = jnp.zeros((1, 1), dtype=jnp.float32)
            # Effective cutoff = min(n_iter, first failing row seen so far).
            k_ref[...] = jnp.full((1, 1), n_iter, dtype=jnp.int32)

        # Upcast AFTER the DMA: narrow dtypes stay narrow through HBM traffic.
        post = post_ref[...].astype(jnp.float32)                    # (T, C)
        row_max = jnp.max(post, axis=-1, keepdims=True)             # (T, 1)

        base = t * tile_n
        idx = base + jax.lax.broadcasted_iota(jnp.int32, (tile_n, 1), 0)

        # First failing (row_max < conf) *global* row index inside this tile.
        fail_idx = jnp.where(row_max < jnp.float32(conf), idx, _BIG_IDX)
        tile_first_fail = jnp.min(fail_idx, axis=0, keepdims=True)  # (1, 1)

        # Carry the python `break` across tiles.
        new_k = jnp.minimum(k_ref[...], tile_first_fail)            # (1, 1)
        k_ref[...] = new_k

        included = idx < new_k                                      # (T, 1) bool

        if output_type in ("class", "all"):
            # PyTorch uses `elif`, so 'all' only ever adds the class maxima.
            vals = jnp.where(included, row_max, jnp.float32(0.0))   # (T, 1)
        else:  # "box"
            boxes = box_ref[...].astype(jnp.float32)                # (T, 4)
            vals = jnp.where(included, boxes, jnp.float32(0.0))     # (T, 4)

        # jnp.where (not multiply) keeps any garbage/NaN in padded rows out.
        out_ref[...] += jnp.sum(vals, keepdims=True)                # (1, 1)

    if use_boxes:
        def kernel(post_ref, box_ref, out_ref, k_ref):
            body(post_ref, box_ref, out_ref, k_ref)
    else:
        def kernel(post_ref, out_ref, k_ref):
            body(post_ref, None, out_ref, k_ref)

    return kernel


@functools.partial(
    jax.jit, static_argnames=("output_type", "conf", "ratio", "tile_n"))
def yolov8_target_pallas(post_result, pre_post_boxes, *, output_type, conf,
                         ratio, tile_n=512):
    """post_result: (N, C), pre_post_boxes: (N, 4) -> scalar f32."""
    n_det, n_cls = post_result.shape
    n_iter = int(n_det * ratio)

    if output_type not in ("class", "all", "box"):
        # Unknown output_type -> PyTorch builds an empty list -> sum([]) == 0.
        return jnp.float32(0.0)

    use_boxes = output_type == "box"

    # Tile over detections; 512 rows is plenty for pipelining and tiny in VMEM.
    tn = max(8, min(int(tile_n), _round_up(n_det, 8)))
    grid = (pl.cdiv(n_det, tn),)

    kernel = _make_kernel(output_type, float(conf), n_iter, tn, use_boxes)

    in_specs = [pl.BlockSpec((tn, n_cls), lambda i: (i, 0))]
    operands = [post_result]
    if use_boxes:
        # Only DMA the boxes when they are actually read.
        in_specs.append(pl.BlockSpec((tn, 4), lambda i: (i, 0)))
        operands.append(pre_post_boxes)

    bytes_accessed = n_det * n_cls * post_result.dtype.itemsize + 4
    flops = 2 * n_det * n_cls
    if use_boxes:
        bytes_accessed += n_det * 4 * pre_post_boxes.dtype.itemsize
        flops += 2 * n_det * 4

    out = pl.pallas_call(
        kernel,
        out_shape=jax.ShapeDtypeStruct((1, 1), jnp.float32),
        grid_spec=pltpu.PrefetchScalarGridSpec(
            num_scalar_prefetch=0,
            grid=grid,
            in_specs=in_specs,
            # Output block index constant across the grid => resident accumulator.
            out_specs=pl.BlockSpec((1, 1), lambda i: (0, 0)),
            scratch_shapes=[pltpu.VMEM((1, 1), jnp.int32)],  # carried cutoff
        ),
        compiler_params=pltpu.CompilerParams(
            # Reduction axis with a carried cutoff + resident output -> arbitrary.
            dimension_semantics=("arbitrary",),
        ),
        cost_estimate=pl.CostEstimate(
            flops=flops, transcendentals=0, bytes_accessed=bytes_accessed),
    )(*operands)
    return out[0, 0]


def _reference(post_result, pre_post_boxes, output_type, conf, ratio):
    """Pure-python re-implementation of the PyTorch forward (for checking)."""
    result = []
    n_iter = int(post_result.shape[0] * ratio)
    for i in range(n_iter):
        if float(post_result[i].max()) < conf:
            break
        if output_type == "class" or output_type == "all":
            result.append(float(post_result[i].max()))
        elif output_type == "box" or output_type == "all":
            for j in range(4):
                result.append(float(pre_post_boxes[i, j]))
    return float(sum(result))


if __name__ == "__main__":
    key = jax.random.PRNGKey(0)
    k1, k2, k3, k4 = jax.random.split(key, 4)

    conf = 0.5
    ratio = 0.75

    # --- Test 1: small single-tile case, f32 ---
    N1, C1 = 8, 16
    post1 = jax.random.uniform(k1, (N1, C1), dtype=jnp.float32)
    box1 = jax.random.uniform(k2, (N1, 4), dtype=jnp.float32) * 100.0

    for output_type in ("class", "box", "all"):
        got = yolov8_target_pallas(
            post1, box1, output_type=output_type, conf=conf, ratio=ratio)
        got = float(jax.block_until_ready(got))
        want = _reference(jax.device_get(post1), jax.device_get(box1),
                          output_type, conf, ratio)
        assert abs(got - want) < 1e-3 * max(1.0, abs(want)), (output_type, got, want)

    # --- Test 2: multi-tile grid with an early break carried across tiles ---
    N2, C2 = 48, 16
    post2 = jax.random.uniform(k3, (N2, C2), dtype=jnp.float32)
    post2 = post2.at[20].set(post2[20] * 0.01)   # forces the break at i == 20
    box2 = jax.random.uniform(k4, (N2, 4), dtype=jnp.float32) * 100.0

    for output_type in ("class", "box", "all"):
        got = yolov8_target_pallas(
            post2, box2, output_type=output_type, conf=conf, ratio=0.9, tile_n=16)
        got = float(jax.block_until_ready(got))
        want = _reference(jax.device_get(post2), jax.device_get(box2),
                          output_type, conf, 0.9)
        assert abs(got - want) < 1e-3 * max(1.0, abs(want)), (output_type, got, want)

    # --- Test 3: bf16 inputs stay bf16 through the DMA (upcast inside kernel) ---
    post3 = post1.astype(jnp.bfloat16)
    box3 = box1.astype(jnp.bfloat16)
    post3_np = np.asarray(jax.device_get(post3), dtype=np.float32)
    box3_np = np.asarray(jax.device_get(box3), dtype=np.float32)

    for output_type in ("class", "box", "all"):
        got = yolov8_target_pallas(
            post3, box3, output_type=output_type, conf=conf, ratio=ratio)
        got = float(jax.block_until_ready(got))
        want = _reference(post3_np, box3_np, output_type, conf, ratio)
        assert abs(got - want) < 1e-2 * max(1.0, abs(want)), (output_type, got, want)

    print("KERNEL_OK")
</pallas_src>

<mosaic_0001>
module attributes {stable_mosaic.version = 11 : i64} {
  func.func @kernel(%arg0: i32, %arg1: memref<8x16xf32, #tpu.memory_space<vmem>>, %arg2: memref<1x1xf32, #tpu.memory_space<vmem>>, %arg3: memref<1x1xi32, #tpu.memory_space<vmem>>) attributes {dimension_semantics = [#tpu.dimension_semantics<arbitrary>], iteration_bounds = array<i64: 1>, scalar_prefetch = 0 : i64, scratch_operands = 1 : i64, tpu.core_type = #tpu.core_type<tc>, window_params = [{transform_indices = @transform_0, window_bounds = array<i64: 8, 16>}, {pipeline_mode = #tpu.pipeline_mode<synchronous>, transform_indices = @transform_1, window_bounds = array<i64: 1, 1>}]} {
    %c0_i32 = arith.constant 0 : i32
    %0 = arith.cmpi eq, %arg0, %c0_i32 : i32
    %1 = arith.extui %0 : i1 to i32
    %c0_i32_0 = arith.constant 0 : i32
    %2 = arith.cmpi ne, %1, %c0_i32_0 : i32
    scf.if %2 {
      %cst_14 = arith.constant 0.000000e+00 : f32
      %31 = vector.broadcast %cst_14 : f32 to vector<1x1xf32>
      %c0_15 = arith.constant 0 : index
      %c0_16 = arith.constant 0 : index
      %32 = vector.load %arg2[%c0_15, %c0_16] : memref<1x1xf32, #tpu.memory_space<vmem>>, vector<1x1xf32>
      tpu.vector_store %arg2[%c0_15, %c0_16], %31 {strides = array<i32>} : memref<1x1xf32, #tpu.memory_space<vmem>>, vector<1x1xf32>,
      %c6_i32 = arith.constant 6 : i32
      %33 = vector.broadcast %c6_i32 : i32 to vector<1x1xi32>
      %c0_17 = arith.constant 0 : index
      %c0_18 = arith.constant 0 : index
      %34 = vector.load %arg3[%c0_17, %c0_18] : memref<1x1xi32, #tpu.memory_space<vmem>>, vector<1x1xi32>
      tpu.vector_store %arg3[%c0_17, %c0_18], %33 {strides = array<i32>} : memref<1x1xi32, #tpu.memory_space<vmem>>, vector<1x1xi32>,
    } else {
    }
    %c0 = arith.constant 0 : index
    %c0_1 = arith.constant 0 : index
    %3 = vector.load %arg1[%c0, %c0_1] : memref<8x16xf32, #tpu.memory_space<vmem>>, vector<8x16xf32>
    %cst = arith.constant dense<0xFF800000> : vector<8xf32>
    %4 = vector.multi_reduction <maximumf>, %3, %cst [1] : vector<8x16xf32> to vector<8xf32>
    %5 = vector.shape_cast %4 : vector<8xf32> to vector<8x1xf32>
    %c8_i32 = arith.constant 8 : i32
    %6 = arith.muli %arg0, %c8_i32 : i32
    %7 = tpu.iota {dimensions = array<i32: 0>} : vector<8x1xi32>
    %8 = vector.broadcast %6 : i32 to vector<8x1xi32>
    %9 = arith.addi %8, %7 : vector<8x1xi32>
    %cst_2 = arith.constant 5.000000e-01 : f32
    %10 = vector.broadcast %cst_2 : f32 to vector<8x1xf32>
    %11 = arith.cmpf olt, %5, %10 : vector<8x1xf32>
    %c1073741823_i32 = arith.constant 1073741823 : i32
    %12 = vector.broadcast %c1073741823_i32 : i32 to vector<8x1xi32>
    %13 = arith.select %11, %9, %12 : vector<8x1xi1>, vector<8x1xi32>
    %cst_3 = arith.constant dense<2147483647> : vector<1xi32>
    %14 = vector.multi_reduction <minsi>, %13, %cst_3 [0] : vector<8x1xi32> to vector<1xi32>
    %15 = vector.shape_cast %14 : vector<1xi32> to vector<1x1xi32>
    %c0_4 = arith.constant 0 : index
    %c0_5 = arith.constant 0 : index
    %16 = vector.load %arg3[%c0_4, %c0_5] : memref<1x1xi32, #tpu.memory_space<vmem>>, vector<1x1xi32>
    %17 = arith.minsi %16, %15 : vector<1x1xi32>
    %c0_6 = arith.constant 0 : index
    %c0_7 = arith.constant 0 : index
    %18 = vector.load %arg3[%c0_6, %c0_7] : memref<1x1xi32, #tpu.memory_space<vmem>>, vector<1x1xi32>
    tpu.vector_store %arg3[%c0_6, %c0_7], %17 {strides = array<i32>} : memref<1x1xi32, #tpu.memory_space<vmem>>, vector<1x1xi32>,
    %19 = vector.broadcast %17 : vector<1x1xi32> to vector<8x1xi32>
    %20 = arith.cmpi slt, %9, %19 : vector<8x1xi32>
    %cst_8 = arith.constant 0.000000e+00 : f32
    %21 = vector.broadcast %cst_8 : f32 to vector<8x1xf32>
    %22 = arith.select %20, %5, %21 : vector<8x1xi1>, vector<8x1xf32>
    %c0_9 = arith.constant 0 : index
    %c0_10 = arith.constant 0 : index
    %23 = vector.load %arg2[%c0_9, %c0_10] : memref<1x1xf32, #tpu.memory_space<vmem>>, vector<1x1xf32>
    %24 = vector.shape_cast %22 : vector<8x1xf32> to vector<1x8x1xf32>
    %cst_11 = arith.constant dense<0.000000e+00> : vector<1xf32>
    %25 = vector.multi_reduction <add>, %24, %cst_11 [1, 2] : vector<1x8x1xf32> to vector<1xf32>
    %26 = vector.shape_cast %25 : vector<1xf32> to vector<1x1x1xf32>
    %27 = vector.extract %26[0, 0, 0] : f32 from vector<1x1x1xf32>
    %28 = vector.broadcast %27 : f32 to vector<1x1xf32>
    %29 = arith.addf %23, %28 : vector<1x1xf32>
    %c0_12 = arith.constant 0 : index
    %c0_13 = arith.constant 0 : index
    %30 = vector.load %arg2[%c0_12, %c0_13] : memref<1x1xf32, #tpu.memory_space<vmem>>, vector<1x1xf32>
    tpu.vector_store %arg2[%c0_12, %c0_13], %29 {strides = array<i32>} : memref<1x1xf32, #tpu.memory_space<vmem>>, vector<1x1xf32>,
    return
  }
  func.func @transform_0(%arg0: i32) -> (i32, i32) {
    %c0_i32 = arith.constant 0 : i32
    %c0_i32_0 = arith.constant 0 : i32
    return %arg0, %c0_i32 : i32, i32
  }
  func.func @transform_1(%arg0: i32) -> (i32, i32) {
    %c0_i32 = arith.constant 0 : i32
    %c0_i32_0 = arith.constant 0 : i32
    %c0_i32_1 = arith.constant 0 : i32
    return %c0_i32, %c0_i32_0 : i32, i32
  }
}

</mosaic_0001>

<bundles_post_ra>
// kernel: yolov8_target_pallas.1
= control target key start
LH: loop header
LB: loop body
LE: loop exit
PB: predicated region body
PF: predicated region fallthrough
CT: control target
= control target key end

     0   :  { %6 = vsyncpa [#allocation4], 0  ;;  %s186_s0 = inlined_call_operand.hbm [shape: f32[8,16], index: 0, kind: input, shape index: {}]   ;;  %s187_s1 = inlined_call_operand.hbm [shape: f32[1,1], index: 1, kind: output, shape index: {}]  }
   0x1   :  { %7 = vsyncpa [#allocation5], 0  ;;  %s144_s6 = smov [#allocation3]   ;;  %s96_s10 = scalar_lea.hbm %s186_s0, 128 }
   0x2   :  { %s14_s7 = sshll.u32 %s144_s6, 4  ;;  %p97_p0 = scmp.ne.s32.totalorder %s186_s0, %s96_s10  ;;  %s15_s7 = int_to_ptr.vmem [resolvable:$true] %s14_s7 }
   0x3   :  { %p100_p1 = scmp.lt.u32.totalorder %s96_s10, %s186_s0 }
   0x5   :  { %p102_p2 = pnand %p100_p1, %p97_p0 }
   0x7   :  { %105 = shalt.err (!%p102_p2)
}
   0x8   :  { %s106_s15 = scalar_lea.vmem %s15_s7, 128  ;;  %p111_p4 = scmp.lt.s32.totalorder %s15_s7, %s15_s7 }
   0x9   :  { %p107_p3 = scmp.ne.s32.totalorder %s15_s7, %s106_s15  ;;  %p112_p5 = scmp.lt.s32.totalorder %s106_s15, %s106_s15 }
   0xb   :  { %p113_p6 = por %p112_p5, %p111_p4 }
   0xd   :  { %p114_p7 = pnand %p113_p6, %p107_p3 }
   0xf   :  { %117 = shalt.err (!%p114_p7)
}
  0x10   :  { %17 = dma.hbm_to_vmem [thread:$0]  %s186_s0, 128, %s15_s7, [#allocation4]  }
  0x11   :  { %140 = dma.done.wait [#allocation4], 128  }
  0x12   :  { %141 = vsyncadd [#allocation4], 4294967168  ;;  %vm25_vm0 = vcmask 0   ;;  %v145_v0 = vmov 0.0   ;;  %v146_v1 = vmov 6   ;;  %vm29_vm1 = vcmask 130048  }
  0x13   :  { %26 = vst.msk [vmem:[#allocation6] sm:$0x1] %vm25_vm0, %v145_v0  ;;  %27 = vst.msk [vmem:[#allocation2] sm:$0x1] %vm25_vm0, %v146_v1  ;;  %v28_v2 = vld [vmem:[#allocation3] sm:$0xff]  ;;  %v34_v4 = vlaneseq  ;;  %vm61_vm7 = vcmask 7168  }
  0x14   :  { %v30_v3 = vsel %vm29_vm1, %v28_v2, -inf  ;;  %s147_s0 = smov [#allocation6]  }
  0x15   :  { %31 = vmax.xlane.f32.xlu0 %v30_v3  ;;  %v35_v5 = vshrl.u32 %v34_v4, 7  ;;  %s81_s18 = sshll.u32 %s147_s0, 4  ;;  %s82_s18 = int_to_ptr.vmem [resolvable:$true] %s81_s18 }
  0x16   :  { %s118_s20 = scalar_lea.vmem %s82_s18, 16  ;;  %s122_s21 = scalar_lea.vmem %s82_s18, 32 }
  0x17   :  { %v56_v14 = vsub.s32 0, %v35_v5  ;;  %p119_p8 = scmp.ne.s32.totalorder %s82_s18, %s118_s20  ;;  %p123_p9 = scmp.lt.s32.totalorder %s82_s18, %s82_s18 }
  0x18   :  { %p124_p10 = scmp.lt.s32.totalorder %s122_s21, %s118_s20 }
  0x1a   :  { %v49_v13 = vld [vmem:[#allocation2] sm:$0x1]  ;;  %v60_v27 = vld [vmem:[#allocation6] sm:$0x1]  ;;  %p125_p11 = por %p124_p10, %p123_p9 }
  0x1c   :  { %p126_p12 = pnand %p125_p11, %p119_p8 }
  0xa2   :  { %v32_v6 = vpop.xlane.xlu0 %31 }
  0xa3   :  { %vm38_vm2 = vcmp.lt.f32.partialorder %v32_v6, 0.5 }
  0xa4   :  { %v39_v7 = vsel %vm38_vm2, %v35_v5, 1073741823 }
  0xa5   :  { %v40_v8 = vrot.slane %v39_v7, 4 }
  0xa7   :  { %vm41_vm3 = vcmp.lt.s32.totalorder %v39_v7, %v40_v8 }
  0xa8   :  { %v42_v9 = vsel %vm41_vm3, %v39_v7, %v40_v8 }
  0xa9   :  { %v43_v10 = vrot.slane %v42_v9, 2 }
  0xab   :  { %vm44_vm4 = vcmp.lt.s32.totalorder %v42_v9, %v43_v10 }
  0xac   :  { %v45_v11 = vsel %vm44_vm4, %v42_v9, %v43_v10 }
  0xad   :  { %v46_v12 = vrot.slane %v45_v11, 1 }
  0xaf   :  { %vm47_vm5 = vcmp.lt.s32.totalorder %v45_v11, %v46_v12 }
  0xb0   :  { %v48_v15 = vsel %vm47_vm5, %v45_v11, %v46_v12 }
  0xb1   :  { %vm50_vm6 = vcmp.lt.s32.totalorder %v49_v13, %v48_v15 }
  0xb2   :  { %v51_v16 = vsel %vm50_vm6, %v49_v13, %v48_v15 }
  0xb3   :  { %v57_v17 = vrot.slane %v51_v16, %v56_v14  ;;  %53 = vst.msk [vmem:[#allocation2] sm:$0x1] %vm25_vm0, %v51_v16 }
  0xb5   :  { %vm58_vm8 = vcmp.lt.s32.totalorder %v35_v5, %v57_v17 }
  0xb6   :  { %v59_v18 = vsel %vm58_vm8, %v32_v6, 0.0 }
  0xb7   :  { %v62_v19 = vsel %vm61_vm7, %v59_v18, 0.0 }
  0xb8   :  { %63 = vadd.xlane.f32.xlu0 %v62_v19 }
 0x145   :  { %v64_v20 = vpop.xlane.xlu0 %63 }
 0x146   :  { %v65_v21 = vrot.slane %v64_v20, 4 }
 0x148   :  { %v66_v22 = vadd.f32 %v65_v21, %v64_v20 }
 0x14a   :  { %v67_v23 = vrot.slane %v66_v22, 2 }
 0x14c   :  { %v68_v24 = vadd.f32 %v67_v23, %v66_v22 }
 0x14e   :  { %v69_v25 = vrot.slane %v68_v24, 1 }
 0x150   :  { %v70_v26 = vadd.f32 %v69_v25, %v68_v24 }
 0x152   :  { %90 = vpush %v70_v26 }
 0x183   :  { %s91_s19 = spop %90 }
 0x184   :  { %v72_v28 = vstv %s91_s19 }
 0x185   :  { %v73_v29 = vadd.f32 %v72_v28, %v60_v27 }
 0x187   :  { %74 = vst.msk [vmem:[#allocation6] sm:$0x1] %vm25_vm0, %v73_v29 }
 0x188   :  { %129 = shalt.err (!%p126_p12)
}
 0x189   :  { %s130_s24 = scalar_lea.hbm %s187_s1, 16 }
 0x18a   :  { %p131_p13 = scmp.ne.s32.totalorder %s187_s1, %s130_s24  ;;  %p134_p0 = scmp.lt.u32.totalorder %s130_s24, %s187_s1 }
 0x18c   :  { %p136_p1 = pnand %p134_p0, %p131_p13 }
 0x18e   :  { %139 = shalt.err (!%p136_p1)
}
 0x18f   :  { %84 = dma.vmem_to_hbm [thread:$0]  %s82_s18, 16, %s187_s1, [#allocation5]  }
 0x190   :  { %142 = dma.done.wait [#allocation5], 16  }
 0x191   :  { %143 = vsyncadd [#allocation5], 4294967280 }
 0x192   :  { %88 = vsyncpa [#allocation4], 1 }
 0x193   :  { %89 = vsyncpa [#allocation5], 1 }

</bundles_post_ra>
